<compile_context>
chip_gen: v7x
topology: tpu7x:2x2x1
jax: 0.10.0
libtpu: 0.0.40
codegen_flags: <defaults>
</compile_context>

<pallas_src>
import numpy as np
import jax
import jax.numpy as jnp
from jax.experimental import pallas as pl
from jax.experimental.pallas import tpu as pltpu


def _round_up(n, m):
    return ((n + m - 1) // m) * m


def critic_kernel(xt_ref, at_ref, w1t_ref, b1_ref, w2xt_ref, w2at_ref, b2_ref,
                  w3t_ref, b3_ref, o_ref):
    xt = xt_ref[...]                                   # (nb_states, TB)
    at = at_ref[...]                                   # (nb_actions, TB)

    # fc1 + ReLU:  h1ᵀ = relu(W1ᵀ @ xᵀ + b1)            -> (20, TB)
    h1 = jnp.dot(w1t_ref[...], xt, preferred_element_type=jnp.float32)
    h1 = jnp.maximum(h1 + b1_ref[...], 0.0)

    # fc2 + ReLU on concat([h1, a]) as an exact split matmul -> (50, TB)
    h2 = (jnp.dot(w2xt_ref[...], h1, preferred_element_type=jnp.float32)
          + jnp.dot(w2at_ref[...], at, preferred_element_type=jnp.float32)
          + b2_ref[...])
    h2 = jnp.maximum(h2, 0.0)

    # fc3: (1, 50) @ (50, TB) -> lane-dense (1, TB)
    out = jnp.dot(w3t_ref[...], h2, preferred_element_type=jnp.float32) + b3_ref[...]
    o_ref[...] = out.astype(o_ref.dtype)


def critic_forward(x, a, kparams, *, block_b=2048):
    """x: (B, nb_states), a: (B, nb_actions) -> (B, 1)."""
    w1t, b1c, w2xt, w2at, b2c, w3t, b3c = kparams
    B = x.shape[0]
    S = x.shape[1]
    A = a.shape[1]

    # Batch tile: multiple of 128 (batch is on the lane axis), capped so that
    # the grid has at least 2 steps when B allows it (v7x megacore split).
    tb = max(128, min(_round_up(block_b, 128), _round_up(pl.cdiv(B, 2), 128)))
    b_pad = _round_up(B, tb)

    # Single pre-transposed + padded materialization per input (no concat).
    def to_slab(v):
        vt = v.astype(jnp.float32).T                  # (F, B)
        if b_pad != B:
            vt = jnp.pad(vt, ((0, 0), (0, b_pad - B)))
        return vt

    xt = to_slab(x)                                   # (S, b_pad)
    at = to_slab(a)                                   # (A, b_pad)

    const2d = lambda i: (0, 0)   # weights/biases stay VMEM-resident across grid
    out = pl.pallas_call(
        critic_kernel,
        out_shape=jax.ShapeDtypeStruct((1, b_pad), jnp.float32),
        grid=(b_pad // tb,),
        in_specs=[
            pl.BlockSpec((S, tb), lambda i: (0, i)),      # xᵀ tile
            pl.BlockSpec((A, tb), lambda i: (0, i)),      # aᵀ tile
            pl.BlockSpec(w1t.shape, const2d),
            pl.BlockSpec(b1c.shape, const2d),
            pl.BlockSpec(w2xt.shape, const2d),
            pl.BlockSpec(w2at.shape, const2d),
            pl.BlockSpec(b2c.shape, const2d),
            pl.BlockSpec(w3t.shape, const2d),
            pl.BlockSpec(b3c.shape, const2d),
        ],
        out_specs=pl.BlockSpec((1, tb), lambda i: (0, i)),
        compiler_params=pltpu.CompilerParams(
            dimension_semantics=("parallel",)),
    )(xt, at, w1t, b1c, w2xt, w2at, b2c, w3t, b3c)

    # (1, b_pad) -> (b_pad, 1) is a free contiguous reshape; drop padded rows.
    return out.reshape(b_pad, 1)[:B]


def init_critic_params(key, nb_states, nb_actions, init_w=0.003):
    """Deterministic init mirroring the PyTorch module's init scheme.

    fc1/fc2 weights: uniform(-1/sqrt(out_features), +1/sqrt(out_features))
      (fanin_init uses weight.size()[0] == out_features).
    fc3 weight: uniform(-init_w, +init_w).
    Biases: PyTorch Linear default uniform(-1/sqrt(in_features), +1/sqrt(in_features)).
    Weights are returned in (in_features, out_features) layout.
    """
    ks = jax.random.split(key, 6)
    h1, h2 = 20, 50

    v1 = 1.0 / np.sqrt(h1)
    w1 = jax.random.uniform(ks[0], (nb_states, h1), jnp.float32, -v1, v1)
    bb1 = 1.0 / np.sqrt(nb_states)
    b1 = jax.random.uniform(ks[1], (h1,), jnp.float32, -bb1, bb1)

    v2 = 1.0 / np.sqrt(h2)
    w2 = jax.random.uniform(ks[2], (h1 + nb_actions, h2), jnp.float32, -v2, v2)
    bb2 = 1.0 / np.sqrt(h1 + nb_actions)
    b2 = jax.random.uniform(ks[3], (h2,), jnp.float32, -bb2, bb2)

    w3 = jax.random.uniform(ks[4], (h2, 1), jnp.float32, -init_w, init_w)
    bb3 = 1.0 / np.sqrt(h2)
    b3 = jax.random.uniform(ks[5], (1,), jnp.float32, -bb3, bb3)

    return (w1, b1, w2, b2, w3, b3)


def prepare_kernel_params(params):
    """Repack raw (in, out)-layout params for the transposed (batch-on-lane) kernel."""
    w1, b1, w2, b2, w3, b3 = params
    h1 = w1.shape[1]
    w1t = jnp.asarray(w1, jnp.float32).T               # (20, nb_states)
    w2xt = jnp.asarray(w2[:h1, :], jnp.float32).T      # (50, 20)
    w2at = jnp.asarray(w2[h1:, :], jnp.float32).T      # (50, nb_actions)
    w3t = jnp.asarray(w3, jnp.float32).T               # (1, 50)
    return (w1t, jnp.asarray(b1, jnp.float32).reshape(-1, 1),
            w2xt, w2at, jnp.asarray(b2, jnp.float32).reshape(-1, 1),
            w3t, jnp.asarray(b3, jnp.float32).reshape(1, 1))


def critic_reference(x, a, params):
    """Pure-JAX reference matching the PyTorch forward."""
    w1, b1, w2, b2, w3, b3 = params
    h1 = jnp.maximum(x @ w1 + b1, 0.0)
    h2 = jnp.maximum(jnp.concatenate([h1, a], axis=1) @ w2 + b2, 0.0)
    return h2 @ w3 + b3


if __name__ == "__main__":
    nb_states, nb_actions, batch = 4, 2, 8

    key = jax.random.PRNGKey(0)
    k_params, k_x, k_a = jax.random.split(key, 3)

    raw_params = init_critic_params(k_params, nb_states, nb_actions)
    kparams = prepare_kernel_params(raw_params)

    x = jax.random.normal(k_x, (batch, nb_states), jnp.float32)
    a = jax.random.normal(k_a, (batch, nb_actions), jnp.float32)

    out = critic_forward(x, a, kparams)
    jax.block_until_ready(out)
    ref = critic_reference(x, a, raw_params)
    np.testing.assert_allclose(np.asarray(out), np.asarray(ref),
                               rtol=1e-5, atol=1e-5)
    assert out.shape == (batch, 1)

    # Exercise the multi-step (megacore-splittable) + padded path:
    # B=300, tile capped -> grid > 1, B not a multiple of the tile.
    batch2 = 300
    k_x2, k_a2 = jax.random.split(jax.random.PRNGKey(1))
    x2 = jax.random.normal(k_x2, (batch2, nb_states), jnp.float32)
    a2 = jax.random.normal(k_a2, (batch2, nb_actions), jnp.float32)
    out2 = critic_forward(x2, a2, kparams)              # default tile -> grid=2
    jax.block_until_ready(out2)
    ref2 = critic_reference(x2, a2, raw_params)
    np.testing.assert_allclose(np.asarray(out2), np.asarray(ref2),
                               rtol=1e-5, atol=1e-5)
    assert out2.shape == (batch2, 1)

    # Small forced tile (non-multiple-of-128 request gets rounded up) -> grid=3.
    out3 = critic_forward(x2, a2, kparams, block_b=100)
    jax.block_until_ready(out3)
    np.testing.assert_allclose(np.asarray(out3), np.asarray(ref2),
                               rtol=1e-5, atol=1e-5)

    print("KERNEL_OK")
</pallas_src>

<mosaic_0001>
module attributes {stable_mosaic.version = 11 : i64} {
  func.func @critic_kernel(%arg0: i32, %arg1: memref<4x128xf32, #tpu.memory_space<vmem>>, %arg2: memref<2x128xf32, #tpu.memory_space<vmem>>, %arg3: memref<20x4xf32, #tpu.memory_space<vmem>>, %arg4: memref<20x1xf32, #tpu.memory_space<vmem>>, %arg5: memref<50x20xf32, #tpu.memory_space<vmem>>, %arg6: memref<50x2xf32, #tpu.memory_space<vmem>>, %arg7: memref<50x1xf32, #tpu.memory_space<vmem>>, %arg8: memref<1x50xf32, #tpu.memory_space<vmem>>, %arg9: memref<1x1xf32, #tpu.memory_space<vmem>>, %arg10: memref<1x128xf32, #tpu.memory_space<vmem>>) attributes {dimension_semantics = [#tpu.dimension_semantics<parallel>], iteration_bounds = array<i64: 1>, scalar_prefetch = 0 : i64, scratch_operands = 0 : i64, tpu.core_type = #tpu.core_type<tc>, window_params = [{transform_indices = @transform_0, window_bounds = array<i64: 4, 128>}, {transform_indices = @transform_1, window_bounds = array<i64: 2, 128>}, {pipeline_mode = #tpu.pipeline_mode<synchronous>, transform_indices = @transform_2, window_bounds = array<i64: 20, 4>}, {pipeline_mode = #tpu.pipeline_mode<synchronous>, transform_indices = @transform_3, window_bounds = array<i64: 20, 1>}, {pipeline_mode = #tpu.pipeline_mode<synchronous>, transform_indices = @transform_4, window_bounds = array<i64: 50, 20>}, {pipeline_mode = #tpu.pipeline_mode<synchronous>, transform_indices = @transform_5, window_bounds = array<i64: 50, 2>}, {pipeline_mode = #tpu.pipeline_mode<synchronous>, transform_indices = @transform_6, window_bounds = array<i64: 50, 1>}, {pipeline_mode = #tpu.pipeline_mode<synchronous>, transform_indices = @transform_7, window_bounds = array<i64: 1, 50>}, {pipeline_mode = #tpu.pipeline_mode<synchronous>, transform_indices = @transform_8, window_bounds = array<i64: 1, 1>}, {transform_indices = @transform_9, window_bounds = array<i64: 1, 128>}]} {
    %c0 = arith.constant 0 : index
    %c0_0 = arith.constant 0 : index
    %0 = vector.load %arg1[%c0, %c0_0] : memref<4x128xf32, #tpu.memory_space<vmem>>, vector<4x128xf32>
    %c0_1 = arith.constant 0 : index
    %c0_2 = arith.constant 0 : index
    %1 = vector.load %arg2[%c0_1, %c0_2] : memref<2x128xf32, #tpu.memory_space<vmem>>, vector<2x128xf32>
    %c0_3 = arith.constant 0 : index
    %c0_4 = arith.constant 0 : index
    %2 = vector.load %arg3[%c0_3, %c0_4] : memref<20x4xf32, #tpu.memory_space<vmem>>, vector<20x4xf32>
    %cst = arith.constant dense<0.000000e+00> : vector<20x128xf32>
    %3 = tpu.matmul %2, %0, %cst {dimension_numbers = #tpu.dot_dimension_numbers<[1], [0], [0], [1], [0, 0, 1, 1], [], []>} : vector<20x4xf32>, vector<4x128xf32>, vector<20x128xf32> -> vector<20x128xf32>
    %c0_5 = arith.constant 0 : index
    %c0_6 = arith.constant 0 : index
    %4 = vector.load %arg4[%c0_5, %c0_6] : memref<20x1xf32, #tpu.memory_space<vmem>>, vector<20x1xf32>
    %5 = vector.broadcast %4 : vector<20x1xf32> to vector<20x128xf32>
    %6 = arith.addf %3, %5 : vector<20x128xf32>
    %cst_7 = arith.constant 0.000000e+00 : f32
    %7 = vector.broadcast %cst_7 : f32 to vector<20x128xf32>
    %8 = arith.maximumf %6, %7 : vector<20x128xf32>
    %c0_8 = arith.constant 0 : index
    %c0_9 = arith.constant 0 : index
    %9 = vector.load %arg5[%c0_8, %c0_9] : memref<50x20xf32, #tpu.memory_space<vmem>>, vector<50x20xf32>
    %cst_10 = arith.constant dense<0.000000e+00> : vector<50x128xf32>
    %10 = tpu.matmul %9, %8, %cst_10 {dimension_numbers = #tpu.dot_dimension_numbers<[1], [0], [0], [1], [0, 0, 1, 1], [], []>} : vector<50x20xf32>, vector<20x128xf32>, vector<50x128xf32> -> vector<50x128xf32>
    %c0_11 = arith.constant 0 : index
    %c0_12 = arith.constant 0 : index
    %11 = vector.load %arg6[%c0_11, %c0_12] : memref<50x2xf32, #tpu.memory_space<vmem>>, vector<50x2xf32>
    %cst_13 = arith.constant dense<0.000000e+00> : vector<50x128xf32>
    %12 = tpu.matmul %11, %1, %cst_13 {dimension_numbers = #tpu.dot_dimension_numbers<[1], [0], [0], [1], [0, 0, 1, 1], [], []>} : vector<50x2xf32>, vector<2x128xf32>, vector<50x128xf32> -> vector<50x128xf32>
    %13 = arith.addf %10, %12 : vector<50x128xf32>
    %c0_14 = arith.constant 0 : index
    %c0_15 = arith.constant 0 : index
    %14 = vector.load %arg7[%c0_14, %c0_15] : memref<50x1xf32, #tpu.memory_space<vmem>>, vector<50x1xf32>
    %15 = vector.broadcast %14 : vector<50x1xf32> to vector<50x128xf32>
    %16 = arith.addf %13, %15 : vector<50x128xf32>
    %cst_16 = arith.constant 0.000000e+00 : f32
    %17 = vector.broadcast %cst_16 : f32 to vector<50x128xf32>
    %18 = arith.maximumf %16, %17 : vector<50x128xf32>
    %c0_17 = arith.constant 0 : index
    %c0_18 = arith.constant 0 : index
    %19 = vector.load %arg8[%c0_17, %c0_18] : memref<1x50xf32, #tpu.memory_space<vmem>>, vector<1x50xf32>
    %cst_19 = arith.constant dense<0.000000e+00> : vector<1x128xf32>
    %20 = tpu.matmul %19, %18, %cst_19 {dimension_numbers = #tpu.dot_dimension_numbers<[1], [0], [0], [1], [0, 0, 1, 1], [], []>} : vector<1x50xf32>, vector<50x128xf32>, vector<1x128xf32> -> vector<1x128xf32>
    %c0_20 = arith.constant 0 : index
    %c0_21 = arith.constant 0 : index
    %21 = vector.load %arg9[%c0_20, %c0_21] : memref<1x1xf32, #tpu.memory_space<vmem>>, vector<1x1xf32>
    %22 = vector.broadcast %21 : vector<1x1xf32> to vector<1x128xf32>
    %23 = arith.addf %20, %22 : vector<1x128xf32>
    %c0_22 = arith.constant 0 : index
    %c0_23 = arith.constant 0 : index
    %24 = vector.load %arg10[%c0_22, %c0_23] : memref<1x128xf32, #tpu.memory_space<vmem>>, vector<1x128xf32>
    tpu.vector_store %arg10[%c0_22, %c0_23], %23 {strides = array<i32>} : memref<1x128xf32, #tpu.memory_space<vmem>>, vector<1x128xf32>,
    return
  }
  func.func @transform_0(%arg0: i32) -> (i32, i32) {
    %c0_i32 = arith.constant 0 : i32
    %c0_i32_0 = arith.constant 0 : i32
    return %c0_i32, %arg0 : i32, i32
  }
  func.func @transform_1(%arg0: i32) -> (i32, i32) {
    %c0_i32 = arith.constant 0 : i32
    %c0_i32_0 = arith.constant 0 : i32
    return %c0_i32, %arg0 : i32, i32
  }
  func.func @transform_2(%arg0: i32) -> (i32, i32) {
    %c0_i32 = arith.constant 0 : i32
    %c0_i32_0 = arith.constant 0 : i32
    %c0_i32_1 = arith.constant 0 : i32
    return %c0_i32, %c0_i32_0 : i32, i32
  }
  func.func @transform_3(%arg0: i32) -> (i32, i32) {
    %c0_i32 = arith.constant 0 : i32
    %c0_i32_0 = arith.constant 0 : i32
    %c0_i32_1 = arith.constant 0 : i32
    return %c0_i32, %c0_i32_0 : i32, i32
  }
  func.func @transform_4(%arg0: i32) -> (i32, i32) {
    %c0_i32 = arith.constant 0 : i32
    %c0_i32_0 = arith.constant 0 : i32
    %c0_i32_1 = arith.constant 0 : i32
    return %c0_i32, %c0_i32_0 : i32, i32
  }
  func.func @transform_5(%arg0: i32) -> (i32, i32) {
    %c0_i32 = arith.constant 0 : i32
    %c0_i32_0 = arith.constant 0 : i32
    %c0_i32_1 = arith.constant 0 : i32
    return %c0_i32, %c0_i32_0 : i32, i32
  }
  func.func @transform_6(%arg0: i32) -> (i32, i32) {
    %c0_i32 = arith.constant 0 : i32
    %c0_i32_0 = arith.constant 0 : i32
    %c0_i32_1 = arith.constant 0 : i32
    return %c0_i32, %c0_i32_0 : i32, i32
  }
  func.func @transform_7(%arg0: i32) -> (i32, i32) {
    %c0_i32 = arith.constant 0 : i32
    %c0_i32_0 = arith.constant 0 : i32
    %c0_i32_1 = arith.constant 0 : i32
    return %c0_i32, %c0_i32_0 : i32, i32
  }
  func.func @transform_8(%arg0: i32) -> (i32, i32) {
    %c0_i32 = arith.constant 0 : i32
    %c0_i32_0 = arith.constant 0 : i32
    %c0_i32_1 = arith.constant 0 : i32
    return %c0_i32, %c0_i32_0 : i32, i32
  }
  func.func @transform_9(%arg0: i32) -> (i32, i32) {
    %c0_i32 = arith.constant 0 : i32
    %c0_i32_0 = arith.constant 0 : i32
    return %c0_i32, %arg0 : i32, i32
  }
}

</mosaic_0001>

<bundles_post_ra>
// kernel: tpu_custom_call.1
= control target key start
LH: loop header
LB: loop body
LE: loop exit
PB: predicated region body
PF: predicated region fallthrough
CT: control target
= control target key end

     0   :  { %s981_s0 = inlined_call_operand.vmem [shape: f32[4,128], index: 0, kind: input, shape index: {}]   ;;  %s982_s1 = inlined_call_operand.vmem [shape: f32[2,128], index: 1, kind: input, shape index: {}]   ;;  %s983_s2 = inlined_call_operand.vmem [shape: f32[20,4], index: 2, kind: input, shape index: {}]   ;;  %s984_s3 = inlined_call_operand.vmem [shape: f32[20,1], index: 3, kind: input, shape index: {}]   ;;  %s985_s4 = inlined_call_operand.vmem [shape: f32[50,20], index: 4, kind: input, shape index: {}]   ;;  %s986_s5 = inlined_call_operand.vmem [shape: f32[50,2], index: 5, kind: input, shape index: {}]   ;;  %s987_s6 = inlined_call_operand.vmem [shape: f32[50,1], index: 6, kind: input, shape index: {}]   ;;  %s988_s7 = inlined_call_operand.vmem [shape: f32[1,50], index: 7, kind: input, shape index: {}]   ;;  %s989_s8 = inlined_call_operand.<no memory space> [shape: f32[1,1], index: 8, kind: input, shape index: {}]   ;;  %s990_s9 = inlined_call_operand.hbm [shape: f32[1,128], index: 9, kind: output, shape index: {}]  }
   0x1   :  { %v14_v0 = vstv %s989_s8 }
   0x2   :  { %15 = vst [vmem:[#allocation2] sm:$0x1] %v14_v0 }
   0x3   :  { %v35_v1 = vld [vmem:[%s981_s0] sm:$0xf]  ;;  %vm68_vm0 = vcmask 1043456   ;;  %v754_v3 = vmov 0.0   ;;  %vm755_vm1 = vmmov 0   ;;  %vm58_vm2 = vcmask 31744  }
   0x4   :  { %v37_v2 = vld [vmem:[%s983_s2] sm:$0xff]  ;;  %631 = vmatprep.subr.mxu0 %v754_v3  ;;  %633 = vmatprep.mubr.msk.f32.mxu0 %vm755_vm1, %v754_v3  ;;  %v39_v4 = vld [vmem:[%s983_s2 + $0x10] sm:$0xf]  ;;  %v38_v6 = vld [vmem:[%s983_s2 + $0x8] sm:$0xff]  ;;  %v756_v8 = vmov 0  }
   0x5   :  { %632 = vmatpush3.msk.msra.mxu0 %vm68_vm0, %v35_v1  ;;  %721 = vmatprep.subr.mxu1 %v754_v3  ;;  %v40_v5 = vld [vmem:[%s984_s3] sm:$0xff]  ;;  %v42_v7 = vld [vmem:[%s984_s3 + $0x10] sm:$0xf] }
   0x6   :  { %634 = vmatmul.mubr.msk.f32.vlgmr.msra.gmra.mrb[0].mxu0 %vm58_vm2, %v37_v2  ;;  %722 = vmatpush3.msk.msra.mxu1 %vm68_vm0, %v35_v1 }
   0x7   :  { %636 = vmatprep.mubr.msk.f32.mxu0 %vm755_vm1, %v754_v3  ;;  %639 = vmatprep.mubr.msk.f32.mxu1 %vm755_vm1, %v754_v3 }
   0x8   :  { %640 = vmatmul.mubr.msk.f32.vlgmr.msra.gmra.mrb[0].mxu1 %vm58_vm2, %v39_v4  ;;  %728 = vset.pattern.permute.xlu0 %v756_v8 }
   0x9   :  { %16 = vsyncpa [#allocation4], 0  ;;  %45 = vperm.xlu0 %728, %v40_v5   ;;  %729 = vset.pattern.permute.xlu1 %v756_v8  ;;  %v41_v9 = vld [vmem:[%s984_s3 + $0x8] sm:$0xff]  ;;  %v420_v10 = vld [vmem:[%s987_s6] sm:$0xff]  ;;  %v757_v18 = vmov 0.0|0.0   ;;  %vm191_vm3 = vcmask 1041408  }
   0xa   :  { %637 = vmatmul.mubr.msk.f32.gmra.mrb[2].mxu0 %vm58_vm2, %v38_v6  ;;  %55 = vperm.xlu1 %729, %v42_v7   ;;  %v421_v11 = vld [vmem:[%s987_s6 + $0x8] sm:$0xff]  ;;  %v422_v12 = vld [vmem:[%s987_s6 + $0x10] sm:$0xff]  ;;  %v423_v13 = vld [vmem:[%s987_s6 + $0x18] sm:$0xff]  ;;  %vm169_vm4 = vcmask 15360   ;;  %vm295_vm5 = vcmask 162816   ;;  %vm487_vm6 = vcmask 408576  }
   0xb   :  { %642 = vmatprep.subr.mxu1 %v754_v3  ;;  %644 = vmatprep.mubr.msk.f32.mxu1 %vm755_vm1, %v754_v3  ;;  %v424_v14 = vld [vmem:[%s987_s6 + $0x20] sm:$0xff]  ;;  %v425_v15 = vld [vmem:[%s987_s6 + $0x28] sm:$0xff]  ;;  %v426_v16 = vld [vmem:[%s987_s6 + $0x30] sm:$0x3]  ;;  %s758_s0 = smov [#allocation3]  }
   0xc   :  { %671 = vmatprep.mubr.msk.f32.mxu0 %vm755_vm1, %v754_v3  ;;  %v477_v17 = vld [vmem:[#allocation2] sm:$0x1]  ;;  %709 = vmatprep.subr.bf16.mxu0 %v757_v18  ;;  %v163_v21 = vld [vmem:[%s986_s5 + $0x8] sm:$0xff]  ;;  %v164_v22 = vld [vmem:[%s986_s5 + $0x10] sm:$0xff]  ;;  %s571_s6 = sshll.u32 %s758_s0, 4  ;;  %s572_s6 = int_to_ptr.vmem [resolvable:$true] %s571_s6 }
   0xd   :  { %50 = vperm.xlu0 %728, %v41_v9   ;;  %v36_v19 = vld [vmem:[%s982_s1] sm:$0x3]  ;;  %v165_v23 = vld [vmem:[%s986_s5 + $0x18] sm:$0xff]  ;;  %v167_v25 = vld [vmem:[%s986_s5 + $0x28] sm:$0xff]  ;;  %s730_s16 = scalar_lea.vmem %s572_s6, 16  ;;  %s734_s1 = scalar_lea.vmem %s572_s6, 32 }
   0xe   :  { %429 = vperm.xlu1 %729, %v420_v10   ;;  %643 = vmatpush3.msk.msra.mxu1 %vm191_vm3, %v36_v19  ;;  %v162_v20 = vld [vmem:[%s986_s5] sm:$0xff]  ;;  %v168_v26 = vld [vmem:[%s986_s5 + $0x30] sm:$0x3]  ;;  %v156_v44 = vld [vmem:[%s985_s4 + $0x8] sm:$0xff]  ;;  %p731_p0 = scmp.ne.s32.totalorder %s572_s6, %s730_s16  ;;  %p735_p1 = scmp.lt.s32.totalorder %s572_s6, %s572_s6 }
   0xf   :  { %645 = vmatmul.mubr.msk.f32.vlgmr.msra.gmra.mrb[2].mxu1 %vm169_vm4, %v162_v20  ;;  %712 = vmatprep.subr.bf16.mxu1 %v757_v18  ;;  %v166_v24 = vld [vmem:[%s986_s5 + $0x20] sm:$0xff]  ;;  %v157_v45 = vld [vmem:[%s985_s4 + $0x10] sm:$0xff]  ;;  %v158_v46 = vld [vmem:[%s985_s4 + $0x18] sm:$0xff]  ;;  %p736_p2 = scmp.lt.s32.totalorder %s734_s1, %s730_s16 }
  0x10   :  { %647 = vmatprep.mubr.msk.f32.mxu1 %vm755_vm1, %v754_v3  ;;  %v155_v43 = vld [vmem:[%s985_s4] sm:$0xff]  ;;  %v160_v48 = vld [vmem:[%s985_s4 + $0x28] sm:$0xff]  ;;  %v161_v49 = vld [vmem:[%s985_s4 + $0x30] sm:$0x3] }
  0x11   :  { %434 = vperm.xlu0 %728, %v421_v11   ;;  %v159_v47 = vld [vmem:[%s985_s4 + $0x20] sm:$0xff]  ;;  %p737_p3 = por %p736_p2, %p735_p1 }
  0x12   :  { %439 = vperm.xlu1 %729, %v422_v12  }
  0x13   :  { %648 = vmatmul.mubr.msk.f32.gmra.mrb[4].mxu1 %vm169_vm4, %v163_v21  ;;  %p738_p4 = pnand %p737_p3, %p731_p0 }
  0x14   :  { %650 = vmatprep.mubr.msk.f32.mxu1 %vm755_vm1, %v754_v3 }
  0x15   :  { %444 = vperm.xlu0 %728, %v423_v13  }
  0x16   :  { %449 = vperm.xlu1 %729, %v424_v14  }
  0x17   :  { %651 = vmatmul.mubr.msk.f32.gmra.mrb[6].mxu1 %vm169_vm4, %v164_v22 }
  0x18   :  { %653 = vmatprep.mubr.msk.f32.mxu1 %vm755_vm1, %v754_v3 }
  0x19   :  { %454 = vperm.xlu0 %728, %v425_v15  }
  0x1a   :  { %459 = vperm.xlu1 %729, %v426_v16  }
  0x1b   :  { %654 = vmatmul.mubr.msk.f32.gmra.mrb[8].mxu1 %vm169_vm4, %v165_v23 }
  0x1c   :  { %656 = vmatprep.mubr.msk.f32.mxu1 %vm755_vm1, %v754_v3 }
  0x1d   :  { %480 = vperm.xlu0 %728, %v477_v17  }
  0x1f   :  { %657 = vmatmul.mubr.msk.f32.gmra.mrb[10].mxu1 %vm169_vm4, %v166_v24 }
  0x20   :  { %659 = vmatprep.mubr.msk.f32.mxu1 %vm755_vm1, %v754_v3 }
  0x23   :  { %660 = vmatmul.mubr.msk.f32.gmra.mrb[12].mxu1 %vm169_vm4, %v167_v25 }
  0x24   :  { %662 = vmatprep.mubr.msk.f32.mxu1 %vm755_vm1, %v754_v3 }
  0x27   :  { %663 = vmatmul.mubr.msk.f32.gmra.mrb[14].mxu1 %vm169_vm4, %v168_v26 }
  0x28   :  { %706 = vmatprep.mubr.msk.f32.mxu1 %vm755_vm1, %v754_v3 }
  0x88   :  { %v46_v27 = vpop.permute.xlu0 %45 }
  0x89   :  { %v56_v37 = vpop.permute.xlu1 %55 }
  0x8c   :  { %v51_v33 = vpop.permute.xlu0 %50 }
  0x8d   :  { %v430_v4 = vpop.permute.xlu1 %429 }
  0x90   :  { %v435_v9 = vpop.permute.xlu0 %434 }
  0x91   :  { %v440_v17 = vpop.permute.xlu1 %439 }
  0x94   :  { %v445_v23 = vpop.permute.xlu0 %444 }
  0xd9   :  { %v138_v28 = vpop.f32.mrb[0].mxu0 }
  0xda   :  { %v635_v29 = vpop.f32.mrb[1].mxu0  ;;  %v139_v31 = vadd.f32 %v138_v28, %v46_v27 }
  0xdb   :  { %v148_v30 = vpop.f32.mrb[0].mxu1 }
  0xdc   :  { %v641_v32 = vpop.f32.mrb[1].mxu1  ;;  %v152_v38 = vmax.f32 %v139_v31, 0.0  ;;  %v149_v40 = vadd.f32 %v148_v30, %v56_v37  ;;  %v450_v31 = vpop.permute.xlu1 %449 }
  0xdd   :  { %v143_v34 = vpop.f32.mrb[2].mxu0 }
  0xde   :  { %v144_v35 = vadd.f32 %v143_v34, %v51_v33  ;;  %v638_v36 = vpop.f32.mrb[3].mxu0  ;;  %v154_v42 = vmax.f32 %v149_v40, 0.0 }
  0xdf   :  { %v455_v36 = vpop.permute.xlu0 %454 }
  0xe0   :  { %v153_v39 = vmax.f32 %v144_v35, 0.0 }
  0xe2   :  { %v710_v41 = vpack.c.bf16 %v153_v39, %v152_v38  ;;  %v261_v50 = vpop.f32.mrb[2].mxu1 }
  0xe3   :  { %v646_v51 = vpop.f32.mrb[3].mxu1 }
  0xe4   :  { %711 = vmatpush3.bf16.msra.mxu0 %v710_v41 }
  0xe5   :  { %669 = vmatprep.subr.mxu0 %v754_v3 }
  0xe6   :  { %v266_v52 = vpop.f32.mrb[4].mxu1 }
  0xe7   :  { %v649_v53 = vpop.f32.mrb[5].mxu1 }
  0xe8   :  { %670 = vmatpush3.msk.msra.mxu0 %vm68_vm0, %v154_v42 }
  0xe9   :  { %672 = vmatmul.mubr.msk.f32.vlgmr.msra.gmra.mrb[4].mxu0 %vm295_vm5, %v155_v43  ;;  %v460_v43 = vpop.permute.xlu1 %459 }
  0xea   :  { %674 = vmatprep.mubr.msk.f32.mxu0 %vm755_vm1, %v754_v3  ;;  %v271_v54 = vpop.f32.mrb[6].mxu1 }
  0xeb   :  { %v652_v55 = vpop.f32.mrb[7].mxu1 }
  0xed   :  { %675 = vmatmul.mubr.msk.f32.gmra.mrb[6].mxu0 %vm295_vm5, %v156_v44 }
  0xee   :  { %677 = vmatprep.mubr.msk.f32.mxu0 %vm755_vm1, %v754_v3  ;;  %v276_v56 = vpop.f32.mrb[8].mxu1 }
  0xef   :  { %v655_v57 = vpop.f32.mrb[9].mxu1 }
  0xf1   :  { %678 = vmatmul.mubr.msk.f32.gmra.mrb[8].mxu0 %vm295_vm5, %v157_v45 }
  0xf2   :  { %680 = vmatprep.mubr.msk.f32.mxu0 %vm755_vm1, %v754_v3  ;;  %v281_v58 = vpop.f32.mrb[10].mxu1 }
  0xf3   :  { %v658_v59 = vpop.f32.mrb[11].mxu1 }
  0xf5   :  { %681 = vmatmul.mubr.msk.f32.gmra.mrb[10].mxu0 %vm295_vm5, %v158_v46 }
  0xf6   :  { %683 = vmatprep.mubr.msk.f32.mxu0 %vm755_vm1, %v754_v3  ;;  %v286_v60 = vpop.f32.mrb[12].mxu1 }
  0xf7   :  { %v661_v61 = vpop.f32.mrb[13].mxu1 }
  0xf9   :  { %684 = vmatmul.mubr.msk.f32.gmra.mrb[12].mxu0 %vm295_vm5, %v159_v47  ;;  %v476_v47 = vld [vmem:[%s988_s7] sm:$0x1] }
  0xfa   :  { %686 = vmatprep.mubr.msk.f32.mxu0 %vm755_vm1, %v754_v3  ;;  %v291_v62 = vpop.f32.mrb[14].mxu1 }
  0xfb   :  { %v664_v63 = vpop.f32.mrb[15].mxu1 }
  0xfd   :  { %687 = vmatmul.mubr.msk.f32.gmra.mrb[14].mxu0 %vm295_vm5, %v160_v48 }
  0xfe   :  { %689 = vmatprep.mubr.msk.f32.mxu0 %vm755_vm1, %v754_v3 }
 0x101   :  { %690 = vmatmul.mubr.msk.f32.gmra.mrb[16].mxu0 %vm295_vm5, %v161_v49 }
 0x1bc   :  { %v386_v0 = vpop.f32.mrb[4].mxu0 }
 0x1bd   :  { %v387_v1 = vadd.f32 %v386_v0, %v261_v50  ;;  %v673_v2 = vpop.f32.mrb[5].mxu0  ;;  %v481_v50 = vpop.permute.xlu0 %480 }
 0x1bf   :  { %v462_v6 = vadd.f32 %v430_v4, %v387_v1 }
 0x1c0   :  { %v391_v5 = vpop.f32.mrb[6].mxu0 }
 0x1c1   :  { %v392_v7 = vadd.f32 %v391_v5, %v266_v52  ;;  %v676_v8 = vpop.f32.mrb[7].mxu0  ;;  %v469_v12 = vmax.f32 %v462_v6, 0.0 }
 0x1c3   :  { %v463_v10 = vadd.f32 %v435_v9, %v392_v7 }
 0x1c4   :  { %v396_v11 = vpop.f32.mrb[8].mxu0 }
 0x1c5   :  { %v470_v13 = vmax.f32 %v463_v10, 0.0  ;;  %v397_v14 = vadd.f32 %v396_v11, %v271_v54  ;;  %v679_v15 = vpop.f32.mrb[9].mxu0 }
 0x1c7   :  { %v713_v16 = vpack.c.bf16 %v470_v13, %v469_v12  ;;  %v464_v20 = vadd.f32 %v440_v17, %v397_v14 }
 0x1c8   :  { %v401_v19 = vpop.f32.mrb[10].mxu0 }
 0x1c9   :  { %v402_v21 = vadd.f32 %v401_v19, %v276_v56  ;;  %v682_v22 = vpop.f32.mrb[11].mxu0  ;;  %714 = vmatpush3.bf16.msra.mxu1 %v713_v16  ;;  %v471_v26 = vmax.f32 %v464_v20, 0.0 }
 0x1ca   :  { %715 = vmatprep.subr.bf16.mxu1 %v757_v18 }
 0x1cb   :  { %v465_v24 = vadd.f32 %v445_v23, %v402_v21 }
 0x1cc   :  { %v406_v25 = vpop.f32.mrb[12].mxu0 }
 0x1cd   :  { %v472_v27 = vmax.f32 %v465_v24, 0.0  ;;  %v407_v28 = vadd.f32 %v406_v25, %v281_v58  ;;  %v685_v29 = vpop.f32.mrb[13].mxu0 }
 0x1cf   :  { %v716_v30 = vpack.c.bf16 %v472_v27, %v471_v26  ;;  %v466_v33 = vadd.f32 %v450_v31, %v407_v28 }
 0x1d0   :  { %v411_v32 = vpop.f32.mrb[14].mxu0 }
 0x1d1   :  { %v412_v34 = vadd.f32 %v411_v32, %v286_v60  ;;  %v688_v35 = vpop.f32.mrb[15].mxu0  ;;  %717 = vmatpush3.bf16.msra.mxu1 %v716_v30  ;;  %v473_v39 = vmax.f32 %v466_v33, 0.0 }
 0x1d2   :  { %718 = vmatprep.subr.bf16.mxu1 %v757_v18  ;;  %v483_v18 = vlaneseq }
 0x1d3   :  { %v467_v37 = vadd.f32 %v455_v36, %v412_v34 }
 0x1d4   :  { %v416_v38 = vpop.f32.mrb[16].mxu0  ;;  %v484_v48 = vshrl.u32 %v483_v18, 7 }
 0x1d5   :  { %v474_v40 = vmax.f32 %v467_v37, 0.0  ;;  %v417_v41 = vadd.f32 %v416_v38, %v291_v62  ;;  %v691_v42 = vpop.f32.mrb[17].mxu0 }
 0x1d6   :  { %v485_v49 = vsub.s32 0, %v484_v48 }
 0x1d7   :  { %v719_v44 = vpack.c.bf16 %v474_v40, %v473_v39  ;;  %v468_v45 = vadd.f32 %v460_v43, %v417_v41 }
 0x1d8   :  { %v486_v51 = vrot.slane %v481_v50, %v485_v49 }
 0x1d9   :  { %720 = vmatpush3.bf16.msra.mxu1 %v719_v44  ;;  %v475_v46 = vmax.f32 %v468_v45, 0.0 }
 0x1da   :  { %704 = vmatprep.subr.mxu1 %v754_v3 }
 0x1dd   :  { %705 = vmatpush3.msk.msra.mxu1 %vm191_vm3, %v475_v46 }
 0x1de   :  { %707 = vmatmul.mubr.msk.f32.vlgmr.msra.gmra.mrb[16].mxu1 %vm487_vm6, %v476_v47 }
 0x2b1   :  { %v560_v52 = vpop.f32.mrb[16].mxu1 }
 0x2b2   :  { %v561_v53 = vadd.f32 %v560_v52, %v486_v51  ;;  %v708_v54 = vpop.f32.mrb[17].mxu1 }
 0x2b4   :  { %564 = vst [vmem:[#allocation3] sm:$0x1] %v561_v53 }
 0x2b5   :  { %741 = shalt.err (!%p738_p4)
}
 0x2b6   :  { %s742_s18 = scalar_lea.hbm %s990_s9, 16 }
 0x2b7   :  { %p743_p5 = scmp.ne.s32.totalorder %s990_s9, %s742_s18  ;;  %p746_p6 = scmp.lt.u32.totalorder %s742_s18, %s990_s9 }
 0x2b9   :  { %p748_p7 = pnand %p746_p6, %p743_p5 }
 0x2bb   :  { %751 = shalt.err (!%p748_p7)
}
 0x2bc   :  { %574 = dma.vmem_to_hbm [thread:$0]  %s572_s6, 16, %s990_s9, [#allocation4]  }
 0x2bd   :  { %752 = dma.done.wait [#allocation4], 16  }
 0x2be   :  { %753 = vsyncadd [#allocation4], 4294967280 }
 0x2bf   :  { %578 = vsyncpa [#allocation4], 1 }

</bundles_post_ra>
